<compile_context>
chip_gen: v7x
topology: tpu7x:2x2x1
jax: 0.10.0
libtpu: 0.0.40
codegen_flags: <defaults>
</compile_context>

<pallas_src>
import functools

import jax
import jax.numpy as jnp
import numpy as np
from jax.experimental import pallas as pl
from jax.experimental.pallas import tpu as pltpu

_EPS = 1e-5


def _vmem_limit_bytes():
    """Per-generation VMEM budget: ~3/4 of physical capacity, clamped.

    Falls back to a v7x-safe value (48 MiB) if the query is unavailable.
    """
    try:
        cap = int(pltpu.get_tpu_info().vmem_capacity_bytes)
    except Exception:  # pragma: no cover - defensive; query not critical
        cap = 64 * 1024 * 1024
    return int(max(32 * 1024 * 1024, min(cap * 3 // 4, 112 * 1024 * 1024)))


# --------------------------------------------------------------------------
# in-kernel helpers
# --------------------------------------------------------------------------
def _fill_padded(pad_ref, interior, hs, ws, c):
    """Write the (hs, ws, c) interior plus its 1-pixel zero halo.

    The interior and the left/right halo columns go out as a single
    contiguous (hs, ws+2, c) store; only the two full-width top/bottom halo
    rows are written separately.  This removes the per-step single-sublane
    strided column stores of the previous version.  Done every step (not just
    at program_id==0) so it stays correct when the 'parallel' grid axis is
    sharded across TensorCores (each core has its own scratch instance).
    """
    dt = pad_ref.dtype
    zrow = jnp.zeros((1, ws + 2, c), dt)
    zcol = jnp.zeros((hs, 1, c), dt)
    pad_ref[0:1, :, :] = zrow
    pad_ref[hs + 1:hs + 2, :, :] = zrow
    pad_ref[1:hs + 1, :, :] = jnp.concatenate(
        [zcol, interior.astype(dt), zcol], axis=1)


def _conv3x3_stats(pad_ref, w_ref, y_ref, st_ref, hs, ws, c):
    """3x3 'SAME' conv of the padded activation + fused centered BN stats.

    Nine per-tap MXU matmuls accumulate into an in-register f32 value (no
    explicit im2col VMEM buffer).  Partial BN statistics are stored centered
    (per-grid-step mean and M2) to avoid E[y^2]-mean^2 cancellation; they are
    combined Welford-style in the wrapper glue.
    """
    cout = w_ref.shape[-1]
    acc = jnp.zeros((hs * ws, cout), jnp.float32)
    for ky in range(3):
        for kx in range(3):
            patch = pad_ref[ky:ky + hs, kx:kx + ws, :].reshape(hs * ws, c)
            acc += jnp.dot(patch, w_ref[ky * 3 + kx],
                           preferred_element_type=jnp.float32)

    inv_m = 1.0 / float(hs * ws)
    mean = jnp.sum(acc, axis=0, keepdims=True) * inv_m      # (1, cout)
    cen = acc - mean
    st_ref[0:1, :] = mean
    st_ref[1:2, :] = jnp.sum(cen * cen, axis=0, keepdims=True)   # M2
    y_ref[...] = acc.astype(y_ref.dtype)


# --------------------------------------------------------------------------
# pass 1: maxpool(2) + conv1 + partial BN1 stats       grid = (N,), parallel
# --------------------------------------------------------------------------
def _pool_conv_stats_kernel(x_ref, w_ref, y_ref, st_ref, pad_ref,
                            *, Hp, Wp, Cin):
    # x_ref: (Hp, 2, Wp, 2*Cin) -- the 2x2 pooling window lives in the "2"
    # axis (row parity) and the two lane halves (column parity); both come
    # from a free, layout-preserving reshape in the wrapper, DMA'd directly
    # in matmul_dtype (bf16 input DMA: max commutes with the monotonic cast).
    xb = x_ref[...]
    m = jnp.maximum(xb[:, 0], xb[:, 1])                       # (Hp, Wp, 2*Cin)
    # TODO(synk): at production Cin (>=64) replace this lane-axis split with a
    # single pltpu.roll + max so the column-parity reduction is one XLU op
    # instead of a misaligned lane slice.
    pooled = jnp.maximum(m[:, :, :Cin], m[:, :, Cin:])        # (Hp, Wp, Cin)

    _fill_padded(pad_ref, pooled, Hp, Wp, Cin)
    _conv3x3_stats(pad_ref, w_ref, y_ref, st_ref, Hp, Wp, Cin)


# --------------------------------------------------------------------------
# pass 2: BN1 affine + ReLU + conv2 + partial BN2 stats  grid = (N,), parallel
# --------------------------------------------------------------------------
def _affine_conv_stats_kernel(y1_ref, s_ref, b_ref, w_ref, y2_ref, st_ref,
                              pad_ref, *, Hp, Wp, Cmid):
    # folded BN1 + ReLU, one FMA per element, elementwise math kept in f32.
    # (Note: in the bf16 path the affine is applied to the bf16-rounded y1
    # while the statistics were taken from the f32 accumulator -- a small,
    # documented inconsistency well inside the bf16 tolerance.)
    h = jnp.maximum(y1_ref[...].astype(jnp.float32) * s_ref[...] + b_ref[...],
                    0.0)                                       # (Hp*Wp, Cmid)
    _fill_padded(pad_ref, h.reshape(Hp, Wp, Cmid), Hp, Wp, Cmid)
    _conv3x3_stats(pad_ref, w_ref, y2_ref, st_ref, Hp, Wp, Cmid)


# --------------------------------------------------------------------------
# pass 3: BN2 affine + ReLU (lane-dense, row-tiled elementwise)
# --------------------------------------------------------------------------
def _affine_relu_kernel(y_ref, s_ref, b_ref, o_ref):
    o_ref[...] = jnp.maximum(
        y_ref[...].astype(jnp.float32) * s_ref[...] + b_ref[...], 0.0
    ).astype(o_ref.dtype)


def _pick_row_tile(rows, lane_w, budget_bytes=16 * 1024 * 1024):
    """Largest multiple-of-8 divisor of `rows` whose double-buffered in+out
    tile footprint fits the byte budget. Big tiles amortize the ~0.35us/step
    grid overhead (mem-bound elementwise pass)."""
    cap = max(8, budget_bytes // max(1, lane_w * 4 * 4))
    best = 0
    d = 8
    limit = min(rows, cap)
    while d <= limit:
        if rows % d == 0:
            best = d
        d += 8
    if best:
        return best
    # TODO(synk): rows not divisible by 8 -> single full block; for very large
    # N*Hp this could exceed VMEM and would need a masked tail instead.
    return rows


# --------------------------------------------------------------------------
# wrapper
# --------------------------------------------------------------------------
def _fold_bn(stats, gamma, beta, m_per_item):
    """stats: (N, 2, C) per-item [mean, M2]; Welford-combine across items and
    fold into a per-channel (scale, shift) affine (training-mode biased var)."""
    means = stats[:, 0, :].astype(jnp.float32)                # (N, C)
    m2s = stats[:, 1, :].astype(jnp.float32)
    n_items = stats.shape[0]
    count = n_items * m_per_item
    mean = jnp.mean(means, axis=0)
    m2 = jnp.sum(m2s, axis=0) + m_per_item * jnp.sum((means - mean) ** 2, axis=0)
    var = m2 / count
    scale = gamma * jax.lax.rsqrt(var + _EPS)
    shift = beta - mean * scale
    return (scale.reshape(1, -1).astype(jnp.float32),
            shift.reshape(1, -1).astype(jnp.float32))


def down_forward(x_nchw, w1_hwio, w2_hwio, g1, b1, g2, b2,
                 *, matmul_dtype=jnp.bfloat16, out_dtype=jnp.float32):
    """x_nchw: (N, Cin, H, W); w*_hwio: (3, 3, cin, cout); g/b: (cout,)."""
    N, Cin, H, W = x_nchw.shape
    Hp, Wp = H // 2, W // 2
    Cout = w1_hwio.shape[-1]

    # NCHW -> NHWC, cast to matmul_dtype *before* pooling (halves the pass-1
    # input DMA; bit-identical pooled result since rounding is monotonic).
    x = jnp.transpose(x_nchw, (0, 2, 3, 1)).astype(matmul_dtype)
    # free (layout-preserving) reshape: 2x2 pooling windows become directly
    # indexable inside the kernel; no strided HBM gathers in the wrapper.
    x_r = x.reshape(N, Hp, 2, Wp, 2 * Cin)

    # tap-major weights: (9, cin, cout) -> each tap is a clean (cin, cout) tile
    w1 = w1_hwio.reshape(9, Cin, Cout).astype(matmul_dtype)
    w2 = w2_hwio.reshape(9, Cout, Cout).astype(matmul_dtype)

    vmem_limit = _vmem_limit_bytes()
    cparams = pltpu.CompilerParams(
        dimension_semantics=("parallel",),
        vmem_limit_bytes=vmem_limit,
    )

    # ---- pass 1: maxpool + conv1 (+ BN1 partial stats) -------------------
    y1, st1 = pl.pallas_call(
        functools.partial(_pool_conv_stats_kernel, Hp=Hp, Wp=Wp, Cin=Cin),
        grid=(N,),
        in_specs=[
            pl.BlockSpec((None, Hp, 2, Wp, 2 * Cin), lambda n: (n, 0, 0, 0, 0)),
            pl.BlockSpec((9, Cin, Cout), lambda n: (0, 0, 0)),
        ],
        out_specs=[
            pl.BlockSpec((None, Hp * Wp, Cout), lambda n: (n, 0, 0)),
            pl.BlockSpec((None, 2, Cout), lambda n: (n, 0, 0)),
        ],
        out_shape=[
            jax.ShapeDtypeStruct((N, Hp * Wp, Cout), matmul_dtype),
            jax.ShapeDtypeStruct((N, 2, Cout), jnp.float32),
        ],
        scratch_shapes=[
            pltpu.VMEM((Hp + 2, Wp + 2, Cin), matmul_dtype),     # padded act
        ],
        compiler_params=cparams,
    )(x_r, w1)

    scale1, shift1 = _fold_bn(st1, g1, b1, Hp * Wp)

    # ---- pass 2: BN1 affine + ReLU + conv2 (+ BN2 partial stats) ---------
    y2, st2 = pl.pallas_call(
        functools.partial(_affine_conv_stats_kernel, Hp=Hp, Wp=Wp, Cmid=Cout),
        grid=(N,),
        in_specs=[
            pl.BlockSpec((None, Hp * Wp, Cout), lambda n: (n, 0, 0)),
            pl.BlockSpec((1, Cout), lambda n: (0, 0)),
            pl.BlockSpec((1, Cout), lambda n: (0, 0)),
            pl.BlockSpec((9, Cout, Cout), lambda n: (0, 0, 0)),
        ],
        out_specs=[
            pl.BlockSpec((None, Hp * Wp, Cout), lambda n: (n, 0, 0)),
            pl.BlockSpec((None, 2, Cout), lambda n: (n, 0, 0)),
        ],
        out_shape=[
            jax.ShapeDtypeStruct((N, Hp * Wp, Cout), matmul_dtype),
            jax.ShapeDtypeStruct((N, 2, Cout), jnp.float32),
        ],
        scratch_shapes=[
            pltpu.VMEM((Hp + 2, Wp + 2, Cout), matmul_dtype),
        ],
        compiler_params=cparams,
    )(y1, scale1, shift1, w2)

    scale2, shift2 = _fold_bn(st2, g2, b2, Hp * Wp)

    # ---- pass 3: BN2 affine + ReLU, lane-dense row-tiled -----------------
    rows = N * Hp
    lane_w = Wp * Cout
    row_tile = _pick_row_tile(rows, lane_w)
    y2_rows = y2.reshape(rows, lane_w)               # free reshape (same layout)
    scale2_t = jnp.tile(scale2, (1, Wp))             # (1, Wp*Cout), channel-fast
    shift2_t = jnp.tile(shift2, (1, Wp))

    out_rows = pl.pallas_call(
        _affine_relu_kernel,
        grid=(rows // row_tile,),
        in_specs=[
            pl.BlockSpec((row_tile, lane_w), lambda r: (r, 0)),
            pl.BlockSpec((1, lane_w), lambda r: (0, 0)),
            pl.BlockSpec((1, lane_w), lambda r: (0, 0)),
        ],
        out_specs=pl.BlockSpec((row_tile, lane_w), lambda r: (r, 0)),
        out_shape=jax.ShapeDtypeStruct((rows, lane_w), out_dtype),
        compiler_params=cparams,
    )(y2_rows, scale2_t, shift2_t)

    out = out_rows.reshape(N, Hp, Wp, Cout)
    return jnp.transpose(out, (0, 3, 1, 2))          # NHWC -> NCHW


# --------------------------------------------------------------------------
# pure-JAX reference (independent of the kernels)
# --------------------------------------------------------------------------
def down_reference(x_nchw, w1_hwio, w2_hwio, g1, b1, g2, b2):
    x = jnp.transpose(x_nchw, (0, 2, 3, 1)).astype(jnp.float32)
    pooled = jax.lax.reduce_window(x, -jnp.inf, jax.lax.max,
                                   (1, 2, 2, 1), (1, 2, 2, 1), 'VALID')

    def block(h, w_hwio, g, b):
        y = jax.lax.conv_general_dilated(
            h, w_hwio, (1, 1), 'SAME',
            dimension_numbers=('NHWC', 'HWIO', 'NHWC'))
        mean = jnp.mean(y, axis=(0, 1, 2), keepdims=True)
        var = jnp.mean((y - mean) ** 2, axis=(0, 1, 2), keepdims=True)
        yhat = (y - mean) * jax.lax.rsqrt(var + _EPS)
        return jnp.maximum(yhat * g + b, 0.0)

    h = block(pooled, w1_hwio, g1, b1)
    h = block(h, w2_hwio, g2, b2)
    return jnp.transpose(h, (0, 3, 1, 2))


if __name__ == "__main__":
    key = jax.random.PRNGKey(0)
    kx, k1, k2 = jax.random.split(key, 3)

    N, Cin, H, W = 2, 4, 16, 16
    Cout = 8

    x = jax.random.normal(kx, (N, Cin, H, W), jnp.float32)

    # deterministic synthetic parameters (PyTorch BN default: gamma=1, beta=0)
    w1 = jax.random.normal(k1, (3, 3, Cin, Cout), jnp.float32) * 0.2    # HWIO
    w2 = jax.random.normal(k2, (3, 3, Cout, Cout), jnp.float32) * 0.2   # HWIO
    g1 = jnp.ones((Cout,), jnp.float32)
    b1 = jnp.zeros((Cout,), jnp.float32)
    g2 = jnp.ones((Cout,), jnp.float32)
    b2 = jnp.zeros((Cout,), jnp.float32)

    ref = down_reference(x, w1, w2, g1, b1, g2, b2)

    # f32 MXU-operand path: tight check against the f32 reference.
    out_f32 = jax.block_until_ready(
        down_forward(x, w1, w2, g1, b1, g2, b2, matmul_dtype=jnp.float32))
    assert out_f32.shape == (N, Cout, H // 2, W // 2)
    np.testing.assert_allclose(np.asarray(out_f32), np.asarray(ref),
                               rtol=2e-3, atol=2e-3)

    # bf16 MXU-operand fast path (v6e/v7x guidance): f32 accumulation and
    # f32 BN math; looser tolerance due to bf16 rounding of activations/weights.
    out_bf16 = jax.block_until_ready(
        down_forward(x, w1, w2, g1, b1, g2, b2, matmul_dtype=jnp.bfloat16))
    assert out_bf16.shape == (N, Cout, H // 2, W // 2)
    np.testing.assert_allclose(np.asarray(out_bf16), np.asarray(ref),
                               rtol=5e-2, atol=5e-2)

    print("KERNEL_OK")
</pallas_src>

<mosaic_0001>
module attributes {stable_mosaic.version = 11 : i64} {
  func.func @_pool_conv_stats_kernel(%arg0: i32, %arg1: memref<1x8x2x8x8xf32, #tpu.memory_space<vmem>>, %arg2: memref<9x4x8xf32, #tpu.memory_space<vmem>>, %arg3: memref<1x64x8xf32, #tpu.memory_space<vmem>>, %arg4: memref<1x2x8xf32, #tpu.memory_space<vmem>>, %arg5: memref<10x10x4xf32, #tpu.memory_space<vmem>>) attributes {dimension_semantics = [#tpu.dimension_semantics<parallel>], iteration_bounds = array<i64: 2>, scalar_prefetch = 0 : i64, scratch_operands = 1 : i64, tpu.core_type = #tpu.core_type<tc>, window_params = [{transform_indices = @transform_0, window_bounds = array<i64: 1, 8, 2, 8, 8>}, {pipeline_mode = #tpu.pipeline_mode<synchronous>, transform_indices = @transform_1, window_bounds = array<i64: 9, 4, 8>}, {transform_indices = @transform_2, window_bounds = array<i64: 1, 64, 8>}, {transform_indices = @transform_3, window_bounds = array<i64: 1, 2, 8>}]} {
    %c0 = arith.constant 0 : index
    %c0_0 = arith.constant 0 : index
    %c0_1 = arith.constant 0 : index
    %c0_2 = arith.constant 0 : index
    %c0_3 = arith.constant 0 : index
    %0 = vector.load %arg1[%c0, %c0_0, %c0_1, %c0_2, %c0_3] : memref<1x8x2x8x8xf32, #tpu.memory_space<vmem>>, vector<1x8x2x8x8xf32>
    %1 = vector.shape_cast %0 : vector<1x8x2x8x8xf32> to vector<8x2x8x8xf32>
    %2 = vector.extract_strided_slice %1 {offsets = [0, 0, 0, 0], sizes = [8, 1, 8, 8], strides = [1, 1, 1, 1]} : vector<8x2x8x8xf32> to vector<8x1x8x8xf32>
    %3 = vector.shape_cast %2 : vector<8x1x8x8xf32> to vector<8x8x8xf32>
    %4 = vector.extract_strided_slice %1 {offsets = [0, 1, 0, 0], sizes = [8, 1, 8, 8], strides = [1, 1, 1, 1]} : vector<8x2x8x8xf32> to vector<8x1x8x8xf32>
    %5 = vector.shape_cast %4 : vector<8x1x8x8xf32> to vector<8x8x8xf32>
    %6 = arith.maximumf %3, %5 : vector<8x8x8xf32>
    %7 = vector.extract_strided_slice %6 {offsets = [0, 0, 0], sizes = [8, 8, 4], strides = [1, 1, 1]} : vector<8x8x8xf32> to vector<8x8x4xf32>
    %8 = vector.extract_strided_slice %6 {offsets = [0, 0, 4], sizes = [8, 8, 4], strides = [1, 1, 1]} : vector<8x8x8xf32> to vector<8x8x4xf32>
    %9 = arith.maximumf %7, %8 : vector<8x8x4xf32>
    %cst = arith.constant 0.000000e+00 : f32
    %10 = vector.broadcast %cst : f32 to vector<1x10x4xf32>
    %cst_4 = arith.constant 0.000000e+00 : f32
    %11 = vector.broadcast %cst_4 : f32 to vector<8x1x4xf32>
    %c0_5 = arith.constant 0 : index
    %c0_6 = arith.constant 0 : index
    %c0_7 = arith.constant 0 : index
    %12 = vector.load %arg5[%c0_5, %c0_6, %c0_7] : memref<10x10x4xf32, #tpu.memory_space<vmem>>, vector<1x10x4xf32>
    tpu.vector_store %arg5[%c0_5, %c0_6, %c0_7], %10 {strides = array<i32>} : memref<10x10x4xf32, #tpu.memory_space<vmem>>, vector<1x10x4xf32>,
    %c9 = arith.constant 9 : index
    %c0_8 = arith.constant 0 : index
    %c0_9 = arith.constant 0 : index
    %13 = vector.load %arg5[%c9, %c0_8, %c0_9] : memref<10x10x4xf32, #tpu.memory_space<vmem>>, vector<1x10x4xf32>
    tpu.vector_store %arg5[%c9, %c0_8, %c0_9], %10 {strides = array<i32>} : memref<10x10x4xf32, #tpu.memory_space<vmem>>, vector<1x10x4xf32>,
    %14 = tpu.concatenate %11, %9, %11 in 1 : vector<8x1x4xf32>, vector<8x8x4xf32>, vector<8x1x4xf32> -> vector<8x10x4xf32>
    %c1 = arith.constant 1 : index
    %c0_10 = arith.constant 0 : index
    %c0_11 = arith.constant 0 : index
    %15 = vector.load %arg5[%c1, %c0_10, %c0_11] : memref<10x10x4xf32, #tpu.memory_space<vmem>>, vector<8x10x4xf32>
    tpu.vector_store %arg5[%c1, %c0_10, %c0_11], %14 {strides = array<i32>} : memref<10x10x4xf32, #tpu.memory_space<vmem>>, vector<8x10x4xf32>,
    %cst_12 = arith.constant 0.000000e+00 : f32
    %16 = vector.broadcast %cst_12 : f32 to vector<64x8xf32>
    %c0_13 = arith.constant 0 : index
    %c0_14 = arith.constant 0 : index
    %c0_15 = arith.constant 0 : index
    %17 = vector.load %arg5[%c0_13, %c0_14, %c0_15] : memref<10x10x4xf32, #tpu.memory_space<vmem>>, vector<8x8x4xf32>
    %18 = vector.shape_cast %17 : vector<8x8x4xf32> to vector<64x4xf32>
    %c0_16 = arith.constant 0 : index
    %c0_17 = arith.constant 0 : index
    %c0_18 = arith.constant 0 : index
    %19 = vector.load %arg2[%c0_16, %c0_17, %c0_18] : memref<9x4x8xf32, #tpu.memory_space<vmem>>, vector<1x4x8xf32>
    %20 = vector.shape_cast %19 : vector<1x4x8xf32> to vector<4x8xf32>
    %cst_19 = arith.constant dense<0.000000e+00> : vector<64x8xf32>
    %21 = tpu.matmul %18, %20, %cst_19 {dimension_numbers = #tpu.dot_dimension_numbers<[1], [0], [0], [1], [0, 0, 1, 1], [], []>} : vector<64x4xf32>, vector<4x8xf32>, vector<64x8xf32> -> vector<64x8xf32>
    %22 = arith.addf %16, %21 : vector<64x8xf32>
    %c0_20 = arith.constant 0 : index
    %c1_21 = arith.constant 1 : index
    %c0_22 = arith.constant 0 : index
    %23 = vector.load %arg5[%c0_20, %c1_21, %c0_22] : memref<10x10x4xf32, #tpu.memory_space<vmem>>, vector<8x8x4xf32>
    %24 = vector.shape_cast %23 : vector<8x8x4xf32> to vector<64x4xf32>
    %c1_23 = arith.constant 1 : index
    %c0_24 = arith.constant 0 : index
    %c0_25 = arith.constant 0 : index
    %25 = vector.load %arg2[%c1_23, %c0_24, %c0_25] : memref<9x4x8xf32, #tpu.memory_space<vmem>>, vector<1x4x8xf32>
    %26 = vector.shape_cast %25 : vector<1x4x8xf32> to vector<4x8xf32>
    %cst_26 = arith.constant dense<0.000000e+00> : vector<64x8xf32>
    %27 = tpu.matmul %24, %26, %cst_26 {dimension_numbers = #tpu.dot_dimension_numbers<[1], [0], [0], [1], [0, 0, 1, 1], [], []>} : vector<64x4xf32>, vector<4x8xf32>, vector<64x8xf32> -> vector<64x8xf32>
    %28 = arith.addf %22, %27 : vector<64x8xf32>
    %c0_27 = arith.constant 0 : index
    %c2 = arith.constant 2 : index
    %c0_28 = arith.constant 0 : index
    %29 = vector.load %arg5[%c0_27, %c2, %c0_28] : memref<10x10x4xf32, #tpu.memory_space<vmem>>, vector<8x8x4xf32>
    %30 = vector.shape_cast %29 : vector<8x8x4xf32> to vector<64x4xf32>
    %c2_29 = arith.constant 2 : index
    %c0_30 = arith.constant 0 : index
    %c0_31 = arith.constant 0 : index
    %31 = vector.load %arg2[%c2_29, %c0_30, %c0_31] : memref<9x4x8xf32, #tpu.memory_space<vmem>>, vector<1x4x8xf32>
    %32 = vector.shape_cast %31 : vector<1x4x8xf32> to vector<4x8xf32>
    %cst_32 = arith.constant dense<0.000000e+00> : vector<64x8xf32>
    %33 = tpu.matmul %30, %32, %cst_32 {dimension_numbers = #tpu.dot_dimension_numbers<[1], [0], [0], [1], [0, 0, 1, 1], [], []>} : vector<64x4xf32>, vector<4x8xf32>, vector<64x8xf32> -> vector<64x8xf32>
    %34 = arith.addf %28, %33 : vector<64x8xf32>
    %c1_33 = arith.constant 1 : index
    %c0_34 = arith.constant 0 : index
    %c0_35 = arith.constant 0 : index
    %35 = vector.load %arg5[%c1_33, %c0_34, %c0_35] : memref<10x10x4xf32, #tpu.memory_space<vmem>>, vector<8x8x4xf32>
    %36 = vector.shape_cast %35 : vector<8x8x4xf32> to vector<64x4xf32>
    %c3 = arith.constant 3 : index
    %c0_36 = arith.constant 0 : index
    %c0_37 = arith.constant 0 : index
    %37 = vector.load %arg2[%c3, %c0_36, %c0_37] : memref<9x4x8xf32, #tpu.memory_space<vmem>>, vector<1x4x8xf32>
    %38 = vector.shape_cast %37 : vector<1x4x8xf32> to vector<4x8xf32>
    %cst_38 = arith.constant dense<0.000000e+00> : vector<64x8xf32>
    %39 = tpu.matmul %36, %38, %cst_38 {dimension_numbers = #tpu.dot_dimension_numbers<[1], [0], [0], [1], [0, 0, 1, 1], [], []>} : vector<64x4xf32>, vector<4x8xf32>, vector<64x8xf32> -> vector<64x8xf32>
    %40 = arith.addf %34, %39 : vector<64x8xf32>
    %c1_39 = arith.constant 1 : index
    %c1_40 = arith.constant 1 : index
    %c0_41 = arith.constant 0 : index
    %41 = vector.load %arg5[%c1_39, %c1_40, %c0_41] : memref<10x10x4xf32, #tpu.memory_space<vmem>>, vector<8x8x4xf32>
    %42 = vector.shape_cast %41 : vector<8x8x4xf32> to vector<64x4xf32>
    %c4 = arith.constant 4 : index
    %c0_42 = arith.constant 0 : index
    %c0_43 = arith.constant 0 : index
    %43 = vector.load %arg2[%c4, %c0_42, %c0_43] : memref<9x4x8xf32, #tpu.memory_space<vmem>>, vector<1x4x8xf32>
    %44 = vector.shape_cast %43 : vector<1x4x8xf32> to vector<4x8xf32>
    %cst_44 = arith.constant dense<0.000000e+00> : vector<64x8xf32>
    %45 = tpu.matmul %42, %44, %cst_44 {dimension_numbers = #tpu.dot_dimension_numbers<[1], [0], [0], [1], [0, 0, 1, 1], [], []>} : vector<64x4xf32>, vector<4x8xf32>, vector<64x8xf32> -> vector<64x8xf32>
    %46 = arith.addf %40, %45 : vector<64x8xf32>
    %c1_45 = arith.constant 1 : index
    %c2_46 = arith.constant 2 : index
    %c0_47 = arith.constant 0 : index
    %47 = vector.load %arg5[%c1_45, %c2_46, %c0_47] : memref<10x10x4xf32, #tpu.memory_space<vmem>>, vector<8x8x4xf32>
    %48 = vector.shape_cast %47 : vector<8x8x4xf32> to vector<64x4xf32>
    %c5 = arith.constant 5 : index
    %c0_48 = arith.constant 0 : index
    %c0_49 = arith.constant 0 : index
    %49 = vector.load %arg2[%c5, %c0_48, %c0_49] : memref<9x4x8xf32, #tpu.memory_space<vmem>>, vector<1x4x8xf32>
    %50 = vector.shape_cast %49 : vector<1x4x8xf32> to vector<4x8xf32>
    %cst_50 = arith.constant dense<0.000000e+00> : vector<64x8xf32>
    %51 = tpu.matmul %48, %50, %cst_50 {dimension_numbers = #tpu.dot_dimension_numbers<[1], [0], [0], [1], [0, 0, 1, 1], [], []>} : vector<64x4xf32>, vector<4x8xf32>, vector<64x8xf32> -> vector<64x8xf32>
    %52 = arith.addf %46, %51 : vector<64x8xf32>
    %c2_51 = arith.constant 2 : index
    %c0_52 = arith.constant 0 : index
    %c0_53 = arith.constant 0 : index
    %53 = vector.load %arg5[%c2_51, %c0_52, %c0_53] : memref<10x10x4xf32, #tpu.memory_space<vmem>>, vector<8x8x4xf32>
    %54 = vector.shape_cast %53 : vector<8x8x4xf32> to vector<64x4xf32>
    %c6 = arith.constant 6 : index
    %c0_54 = arith.constant 0 : index
    %c0_55 = arith.constant 0 : index
    %55 = vector.load %arg2[%c6, %c0_54, %c0_55] : memref<9x4x8xf32, #tpu.memory_space<vmem>>, vector<1x4x8xf32>
    %56 = vector.shape_cast %55 : vector<1x4x8xf32> to vector<4x8xf32>
    %cst_56 = arith.constant dense<0.000000e+00> : vector<64x8xf32>
    %57 = tpu.matmul %54, %56, %cst_56 {dimension_numbers = #tpu.dot_dimension_numbers<[1], [0], [0], [1], [0, 0, 1, 1], [], []>} : vector<64x4xf32>, vector<4x8xf32>, vector<64x8xf32> -> vector<64x8xf32>
    %58 = arith.addf %52, %57 : vector<64x8xf32>
    %c2_57 = arith.constant 2 : index
    %c1_58 = arith.constant 1 : index
    %c0_59 = arith.constant 0 : index
    %59 = vector.load %arg5[%c2_57, %c1_58, %c0_59] : memref<10x10x4xf32, #tpu.memory_space<vmem>>, vector<8x8x4xf32>
    %60 = vector.shape_cast %59 : vector<8x8x4xf32> to vector<64x4xf32>
    %c7 = arith.constant 7 : index
    %c0_60 = arith.constant 0 : index
    %c0_61 = arith.constant 0 : index
    %61 = vector.load %arg2[%c7, %c0_60, %c0_61] : memref<9x4x8xf32, #tpu.memory_space<vmem>>, vector<1x4x8xf32>
    %62 = vector.shape_cast %61 : vector<1x4x8xf32> to vector<4x8xf32>
    %cst_62 = arith.constant dense<0.000000e+00> : vector<64x8xf32>
    %63 = tpu.matmul %60, %62, %cst_62 {dimension_numbers = #tpu.dot_dimension_numbers<[1], [0], [0], [1], [0, 0, 1, 1], [], []>} : vector<64x4xf32>, vector<4x8xf32>, vector<64x8xf32> -> vector<64x8xf32>
    %64 = arith.addf %58, %63 : vector<64x8xf32>
    %c2_63 = arith.constant 2 : index
    %c2_64 = arith.constant 2 : index
    %c0_65 = arith.constant 0 : index
    %65 = vector.load %arg5[%c2_63, %c2_64, %c0_65] : memref<10x10x4xf32, #tpu.memory_space<vmem>>, vector<8x8x4xf32>
    %66 = vector.shape_cast %65 : vector<8x8x4xf32> to vector<64x4xf32>
    %c8 = arith.constant 8 : index
    %c0_66 = arith.constant 0 : index
    %c0_67 = arith.constant 0 : index
    %67 = vector.load %arg2[%c8, %c0_66, %c0_67] : memref<9x4x8xf32, #tpu.memory_space<vmem>>, vector<1x4x8xf32>
    %68 = vector.shape_cast %67 : vector<1x4x8xf32> to vector<4x8xf32>
    %cst_68 = arith.constant dense<0.000000e+00> : vector<64x8xf32>
    %69 = tpu.matmul %66, %68, %cst_68 {dimension_numbers = #tpu.dot_dimension_numbers<[1], [0], [0], [1], [0, 0, 1, 1], [], []>} : vector<64x4xf32>, vector<4x8xf32>, vector<64x8xf32> -> vector<64x8xf32>
    %70 = arith.addf %64, %69 : vector<64x8xf32>
    %cst_69 = arith.constant dense<0.000000e+00> : vector<8xf32>
    %71 = vector.multi_reduction <add>, %70, %cst_69 [0] : vector<64x8xf32> to vector<8xf32>
    %72 = vector.shape_cast %71 : vector<8xf32> to vector<1x8xf32>
    %cst_70 = arith.constant 1.562500e-02 : f32
    %73 = vector.broadcast %cst_70 : f32 to vector<1x8xf32>
    %74 = arith.mulf %72, %73 : vector<1x8xf32>
    %75 = vector.broadcast %74 : vector<1x8xf32> to vector<64x8xf32>
    %76 = arith.subf %70, %75 : vector<64x8xf32>
    %c0_71 = arith.constant 0 : index
    %c0_72 = arith.constant 0 : index
    %c0_73 = arith.constant 0 : index
    %77 = vector.load %arg4[%c0_71, %c0_72, %c0_73] : memref<1x2x8xf32, #tpu.memory_space<vmem>>, vector<1x1x8xf32>
    %78 = vector.shape_cast %77 : vector<1x1x8xf32> to vector<1x8xf32>
    %79 = vector.shape_cast %74 : vector<1x8xf32> to vector<1x1x8xf32>
    tpu.vector_store %arg4[%c0_71, %c0_72, %c0_73], %79 {strides = array<i32>} : memref<1x2x8xf32, #tpu.memory_space<vmem>>, vector<1x1x8xf32>,
    %80 = arith.mulf %76, %76 : vector<64x8xf32>
    %cst_74 = arith.constant dense<0.000000e+00> : vector<8xf32>
    %81 = vector.multi_reduction <add>, %80, %cst_74 [0] : vector<64x8xf32> to vector<8xf32>
    %82 = vector.shape_cast %81 : vector<8xf32> to vector<1x8xf32>
    %c0_75 = arith.constant 0 : index
    %c1_76 = arith.constant 1 : index
    %c0_77 = arith.constant 0 : index
    %83 = vector.load %arg4[%c0_75, %c1_76, %c0_77] : memref<1x2x8xf32, #tpu.memory_space<vmem>>, vector<1x1x8xf32>
    %84 = vector.shape_cast %83 : vector<1x1x8xf32> to vector<1x8xf32>
    %85 = vector.shape_cast %82 : vector<1x8xf32> to vector<1x1x8xf32>
    tpu.vector_store %arg4[%c0_75, %c1_76, %c0_77], %85 {strides = array<i32>} : memref<1x2x8xf32, #tpu.memory_space<vmem>>, vector<1x1x8xf32>,
    %c0_78 = arith.constant 0 : index
    %c0_79 = arith.constant 0 : index
    %c0_80 = arith.constant 0 : index
    %86 = vector.load %arg3[%c0_78, %c0_79, %c0_80] : memref<1x64x8xf32, #tpu.memory_space<vmem>>, vector<1x64x8xf32>
    %87 = vector.shape_cast %86 : vector<1x64x8xf32> to vector<64x8xf32>
    %88 = vector.shape_cast %70 : vector<64x8xf32> to vector<1x64x8xf32>
    tpu.vector_store %arg3[%c0_78, %c0_79, %c0_80], %88 {strides = array<i32>} : memref<1x64x8xf32, #tpu.memory_space<vmem>>, vector<1x64x8xf32>,
    return
  }
  func.func @transform_0(%arg0: i32) -> (i32, i32, i32, i32, i32) {
    %c0_i32 = arith.constant 0 : i32
    %c0_i32_0 = arith.constant 0 : i32
    %c0_i32_1 = arith.constant 0 : i32
    %c0_i32_2 = arith.constant 0 : i32
    %c0_i32_3 = arith.constant 0 : i32
    return %arg0, %c0_i32, %c0_i32_0, %c0_i32_1, %c0_i32_2 : i32, i32, i32, i32, i32
  }
  func.func @transform_1(%arg0: i32) -> (i32, i32, i32) {
    %c0_i32 = arith.constant 0 : i32
    %c0_i32_0 = arith.constant 0 : i32
    %c0_i32_1 = arith.constant 0 : i32
    %c0_i32_2 = arith.constant 0 : i32
    return %c0_i32, %c0_i32_0, %c0_i32_1 : i32, i32, i32
  }
  func.func @transform_2(%arg0: i32) -> (i32, i32, i32) {
    %c0_i32 = arith.constant 0 : i32
    %c0_i32_0 = arith.constant 0 : i32
    %c0_i32_1 = arith.constant 0 : i32
    return %arg0, %c0_i32, %c0_i32_0 : i32, i32, i32
  }
  func.func @transform_3(%arg0: i32) -> (i32, i32, i32) {
    %c0_i32 = arith.constant 0 : i32
    %c0_i32_0 = arith.constant 0 : i32
    %c0_i32_1 = arith.constant 0 : i32
    return %arg0, %c0_i32, %c0_i32_0 : i32, i32, i32
  }
}

</mosaic_0001>

<bundles_post_ra>
// kernel: tpu_custom_call.1
= control target key start
LH: loop header
LB: loop body
LE: loop exit
PB: predicated region body
PF: predicated region fallthrough
CT: control target
= control target key end

     0   :  { %9 = vsyncpa [#allocation4], 0  ;;  %s2873_s0 = inlined_call_operand.hbm [shape: f32[2,8,2,8,8], index: 0, kind: input, shape index: {}]   ;;  %s2874_s1 = inlined_call_operand.vmem [shape: f32[9,4,8], index: 1, kind: input, shape index: {}]   ;;  %s2875_s2 = inlined_call_operand.vmem [shape: f32[2,64,8], index: 2, kind: output, shape index: {0}]   ;;  %s2876_s3 = inlined_call_operand.hbm [shape: f32[2,2,8], index: 3, kind: output, shape index: {1}]  }
   0x1   :  { %11 = vsyncpa [#allocation4 + $0x1], 0 }
   0x2   :  { %12 = vsyncpa [#allocation5], 0 }
   0x3   :  { %14 = vsyncpa [#allocation5 + $0x1], 0  ;;  %s2407_s12 = smov 0   ;;  %s2409_s13 = smov 0  }
   0x4   :  { %s2411_s14 = smov 0   ;;  %s2413_s15 = smov 0  }
   0x5 LB: > { %s2428_s16 = sadd.s32 4294967295, %s2379_s15   ;;  %s1854_s17 = sadd.s32 4294967294, %s2379_s15   ;;  %s2379_s15 = sphi %s2413_s15, %s2889_s15   ;;  %s2375_s14 = sphi %s2411_s14, %s2888_s14   ;;  %s2371_s13 = sphi %s2409_s13, %s2887_s13   ;;  %s2367_s12 = sphi %s2407_s12, %s2886_s12  }
   0x6   : > { %s2432_s18 = sadd.s32 1, %s2379_s15   ;;  %s27_s19 = sadd.s32 1, %s2375_s14 }
   0x7   : > { %s24_s20 = ssub.s32 %s2379_s15, %s2432_s18  ;;  %p34_p0 = scmp.ne.s32.totalorder %s2375_s14, %s2371_s13 }
   0x8   : > { %p25_p1 = scmp.eq.s32.totalorder %s24_s20, 0  ;;  %p35_p2 = scmp.eq.s32.totalorder %s2379_s15, 0 }
   0x9   : > { %p40_p3 = scmp.ne.s32.totalorder %s2371_s13, %s2367_s12  ;;  %p41_p4 = scmp.eq.s32.totalorder %s2428_s16, 0 }
   0xa   : > { %s2444_s21 = scalar_select %p25_p1, %s2375_s14, %s27_s19  }
   0xb   : > { %p2446_p5 = por %p35_p2, %p34_p0  ;;  %p2450_p6 = por %p41_p4, %p40_p3 }
   0xc   : > { %p111_p7 = scmp.eq.s32.totalorder %s2428_s16, 1  ;;  %p117_p8 = scmp.eq.s32.totalorder %s1854_s17, 1 }
   0xd   : > { %p2245_p10 = scmp.lt.s32.totalorder %s2379_s15, 2  ;;  %s140_s26 = sand.u32 1, %s2375_s14  }
   0xe   : > { %p2457_p11 = por %p111_p7, %p34_p0  ;;  %p2461_p12 = por %p117_p8, %p40_p3 }
   0xf   : > { %s1958_s27 = sshll.u32 %s2379_s15, 11  ;;  %s1857_s28 = sshll.u32 %s140_s26, 7 }
  0x10   : > { %s2880_s24 = scalar_select %p2457_p11, 1, 0 }
  0x11   : > { %s2881_s25 = scalar_select %p2461_p12, 1, 0 }
  0x12   : > { %s2470_s4 = scalar_lea.hbm %s2873_s0, %s1958_s27  ;;  %s144_s5 = scalar_lea.vmem [#allocation3], %s1857_s28 }
  0x13   : > { %s151_s6 = sshll.u32 %s144_s5, 4  ;;  %p2474_p13 = pnand %p2245_p10, %p2446_p5  ;;  %s2478_s6 = int_to_ptr.vmem [resolvable:$true] %s151_s6 }
  0x14   : > { %s2480_s8 = scalar_lea.sflag [#allocation4], %s140_s26  ;;  %s2283_s9 = scalar_lea.hbm %s2470_s4, 2048 }
  0x15   : > { %p2284_p0 = scmp.ne.s32.totalorder %s2470_s4, %s2283_s9  ;;  %p2285_p1 = pneg %p2474_p13 }
  0x16   : > { %s2288_s17 = scalar_lea.hbm %s2873_s0, 4096  ;;  %p2289_p4 = scmp.lt.u32.totalorder %s2470_s4, %s2873_s0 }
  0x17   : > { %p2286_p2 = pnand %p2285_p1, %p2284_p0  ;;  %p2290_p5 = scmp.lt.u32.totalorder %s2288_s17, %s2283_s9 }
  0x18   : > { %p2292_p8 = scmp.lt.u32.totalorder %s2283_s9, %s2470_s4 }
  0x19   : > { %p2287_p3 = pneg %p2286_p2  ;;  %p2291_p7 = por %p2290_p5, %p2289_p4 }
  0x1b   : > { %p2293_p10 = por %p2292_p8, %p2291_p7 }
  0x1d   : > { %p2294_p9 = pnand %p2293_p10, %p2287_p3 }
  0x1f   : > { %2297 = shalt.err (!%p2294_p9)
}
  0x20   : > { %s2298_s22 = scalar_lea.vmem %s2478_s6, 2048  ;;  %s2381_s26 = smov [#allocation3]  }
  0x21   : > { %p2299_p0 = scmp.ne.s32.totalorder %s2478_s6, %s2298_s22  ;;  %s2303_s27 = sshll.u32 %s2381_s26, 4  ;;  %s2304_s27 = int_to_ptr.vmem [resolvable:$false] %s2303_s27 }
  0x22   : > { %s2305_s28 = scalar_lea.vmem %s2304_s27, 4096  ;;  %p2306_p11 = scmp.lt.s32.totalorder %s2478_s6, %s2304_s27 }
  0x23   : > { %p2301_p2 = pnand %p2299_p0, %p2285_p1  ;;  %p2307_p4 = scmp.lt.s32.totalorder %s2305_s28, %s2298_s22 }
  0x25   : > { %p2302_p12 = pneg %p2301_p2  ;;  %p2308_p5 = por %p2307_p4, %p2306_p11 }
  0x27   : > { %p2309_p7 = pnand %p2308_p5, %p2302_p12 }
  0x29   : > { %2312 = shalt.err (!%p2309_p7)
}
  0x2a   : > { %s2382_s29 = smov 128   ;;  %s2383_s30 = smov 8  }
  0x2b   : > { %2240 = dma.hbm_to_vmem [thread:$0]  (!%p2474_p13), %s2470_s4, 2048, %s2478_s6, %s2480_s8, %s2382_s29, %s2382_s29, %s2383_s30  }
  0x2c   : > { %p1860_p9 = scmp.ge.s32.totalorder %s2379_s15, 1  ;;  %p159_p1 = scmp.lt.s32.totalorder %s2379_s15, 3 }
  0x2e   : > { %p160_p3 = pnand %p1860_p9, %p159_p1 }
  0x2f   : > { %s2511_s5 = sand.u32 (!%p160_p3), 1, %s2371_s13  }
  0x30   : > { %163 = sbr.rel (%p160_p3) target bundleno = 539 (0x21b), region = 28  ;;  %s1861_s9 = sshll.u32 (!%p160_p3), %s2511_s5, 7 }
  0x31   : > { %s166_s10 = scalar_lea.sflag (!%p160_p3), [#allocation4], %s2511_s5  ;;  %s2515_s11 = scalar_lea.vmem (!%p160_p3), [#allocation3], %s1861_s9 }
  0x37   : > { %2358 = dma.done.wait (%p2450_p6), %s166_s10, 2048  }
  0x38   : > { %2360 = vsyncadd (%p2450_p6), %s166_s10, 4294965248  ;;  %vm266_vm0 = vcmask 31744   ;;  %vm268_vm1 = vcmask 25600   ;;  %v2384_v0 = vmov 0.0   ;;  %v202_v1 = vld [vmem:[%s2515_s11] sm:$0xff]  ;;  %v203_v2 = vld [vmem:[%s2515_s11 + $0x8] sm:$0xff] }
  0x39   : > { %267 = vst.msk [vmem:[#allocation2] sm:$0xff] %vm266_vm0, %v2384_v0  ;;  %271 = vst.msk [vmem:[#allocation2 + $0x90] sm:$0xff] %vm266_vm0, %v2384_v0  ;;  %v206_v3 = vld [vmem:[%s2515_s11 + $0x20] sm:$0xff]  ;;  %v218_v4 = vmax.f32 %v202_v1, %v203_v2  ;;  %v207_v5 = vld [vmem:[%s2515_s11 + $0x28] sm:$0xff]  ;;  %s2385_s23 = smov 124   ;;  %vm374_vm2 = vcmask 1043456  }
  0x3a   : > { %269 = vst.msk [vmem:[#allocation2 + $0x8] sm:$0x3] %vm268_vm1, %v2384_v0  ;;  %272 = vst.msk [vmem:[#allocation2 + $0x98] sm:$0x3] %vm268_vm1, %v2384_v0  ;;  %v204_v6 = vld [vmem:[%s2515_s11 + $0x10] sm:$0xff]  ;;  %v205_v7 = vld [vmem:[%s2515_s11 + $0x18] sm:$0xff]  ;;  %v220_v8 = vmax.f32 %v206_v3, %v207_v5 }
  0x3b   : > { %v208_v9 = vld [vmem:[%s2515_s11 + $0x30] sm:$0xff]  ;;  %v209_v10 = vld [vmem:[%s2515_s11 + $0x38] sm:$0xff]  ;;  %234 = vrot.lane.b32.xlu0 %v218_v4, %s2385_s23  ;;  %v219_v11 = vmax.f32 %v204_v6, %v205_v7  ;;  %v210_v13 = vld [vmem:[%s2515_s11 + $0x40] sm:$0xff]  ;;  %vm297_vm3 = vcmask 1040384   ;;  %p197_p6 = scmp.lt.s32.totalorder %s2428_s16, 1  ;;  %vm1666_vm4 = vcmask 64512  }
  0x3c   : > { %238 = vrot.lane.b32.xlu1 %v220_v8, %s2385_s23  ;;  %v221_v12 = vmax.f32 %v208_v9, %v209_v10  ;;  %v211_v14 = vld [vmem:[%s2515_s11 + $0x48] sm:$0xff]  ;;  %v212_v15 = vld [vmem:[%s2515_s11 + $0x50] sm:$0xff]  ;;  %v213_v16 = vld [vmem:[%s2515_s11 + $0x58] sm:$0xff]  ;;  %s1862_s20 = sshll.u32 %s2511_s5, 1  ;;  %vm1697_vm5 = vcmask 57344   ;;  %s1955_s26 = sshll.u32 %s2428_s16, 5 }
  0x3d   : > { %v1865_v17 = vld [vmem:[%s2874_s1 + $0x4] sm:$0xf]  ;;  %v2547_v19 = vld [vmem:[%s2874_s1 + $0x10] sm:$0xf]  ;;  %v222_v20 = vmax.f32 %v210_v13, %v211_v14  ;;  %v2554_v21 = vld [vmem:[%s2874_s1] sm:$0xf]  ;;  %v223_v23 = vmax.f32 %v212_v15, %v213_v16  ;;  %s2827_s30 = scalar_lea.hbm %s2876_s3, %s1955_s26 }
  0x3e   : > { %2041 = vmatprep.subr.msk.mxu1 %vm374_vm2, %v1865_v17  ;;  %v2559_v22 = vld [vmem:[%s2874_s1 + $0x14] sm:$0xf]  ;;  %v214_v24 = vld [vmem:[%s2515_s11 + $0x60] sm:$0xff]  ;;  %v215_v25 = vld [vmem:[%s2515_s11 + $0x68] sm:$0xff]  ;;  %2097 = vmatprep.subr.msk.mxu0 %vm374_vm2, %v2547_v19  ;;  %s198_s6 = scalar_select %p197_p6, %s2428_s16, 1 }
  0x3f   : > { %236 = vrot.lane.b32.xlu0 %v219_v11, %s2385_s23  ;;  %2042 = vmatpush3.msk.msra.mxu1 %vm374_vm2, %v1865_v17  ;;  %v216_v26 = vld [vmem:[%s2515_s11 + $0x70] sm:$0xff]  ;;  %v217_v27 = vld [vmem:[%s2515_s11 + $0x78] sm:$0xff]  ;;  %v224_v28 = vmax.f32 %v214_v24, %v215_v25  ;;  %v1884_v62 = vld [vmem:[%s2874_s1 + $0x8] sm:$0xf]  ;;  %s2810_s22 = scalar_lea.vmem [#allocation6], %s1862_s20  ;;  %s1743_s9 = scalar_lea.sflag [#allocation5], %s2511_s5 }
  0x40   : > { %240 = vrot.lane.b32.xlu1 %v221_v12, %s2385_s23  ;;  %2098 = vmatpush3.msk.msra.mxu0 %vm374_vm2, %v2547_v19  ;;  %v225_v29 = vmax.f32 %v216_v26, %v217_v27  ;;  %v331_v17 = vld [vmem:[#allocation2] sm:$0xff]  ;;  %v1894_v24 = vld [vmem:[%s2874_s1 + $0xc] sm:$0xf]  ;;  %s1959_s7 = sshll.u32 %s198_s6, 6  ;;  %s1759_s27 = sshll.u32 %s2810_s22, 4  ;;  %s2829_s27 = int_to_ptr.vmem [resolvable:$true] %s1759_s27 }
  0x41   : > { %v340_v18 = vld [vmem:[#allocation2 + $0x1] sm:$0xff]  ;;  %2055 = vmatprep.subr.msk.mxu1 %vm374_vm2, %v2554_v21  ;;  %2111 = vmatprep.subr.msk.mxu0 %vm374_vm2, %v2559_v22  ;;  %s2783_s19 = scalar_lea.vmem %s2875_s2, %s1959_s7  ;;  %s2313_s10 = scalar_lea.vmem %s2829_s27, 32 }
  0x42   : > { %2043 = vmatprep.mubr.msk.f32.mxu1 %vm266_vm0, %v340_v18  ;;  %v1934_v18 = vld [vmem:[%s2874_s1 + $0x1c] sm:$0xf]  ;;  %p2314_p11 = scmp.ne.s32.totalorder %s2829_s27, %s2313_s10  ;;  %p2883_p12 = scmp.ne.s32.totalorder %s2880_s24, 0 }
  0x43   : > { %242 = vrot.lane.b32.xlu0 %v222_v20, %s2385_s23  ;;  %s2386_s16 = smov [#allocation6]  }
  0x44   : > { %244 = vrot.lane.b32.xlu1 %v223_v23, %s2385_s23  ;;  %p2315_p13 = pnand %p2314_p11, %p2883_p12  ;;  %s2317_s11 = sshll.u32 %s2386_s16, 4  ;;  %s2318_s11 = int_to_ptr.vmem [resolvable:$false] %s2317_s11 }
  0x45   : > { %p2320_p10 = scmp.lt.s32.totalorder %s2829_s27, %s2318_s11 }
  0x46   : > { %p2316_p8 = pneg %p2315_p13 }
  0x47   : > { %246 = vrot.lane.b32.xlu0 %v224_v28, %s2385_s23 }
  0x48   : > { %248 = vrot.lane.b32.xlu1 %v225_v29, %s2385_s23  ;;  %s2319_s23 = scalar_lea.vmem %s2318_s11, 64 }
  0x49   : > { %p2321_p0 = scmp.lt.s32.totalorder %s2319_s23, %s2313_s10 }
  0x4b   : > { %p2322_p2 = por %p2321_p0, %p2320_p10 }
  0x4d   : > { %p2323_p4 = pnand %p2322_p2, %p2316_p8 }
  0xad   : > { %v235_v30 = vpop.permute.xlu0 %234 }
  0xae   : > { %v258_v31 = vmax.f32 %v218_v4, %v235_v30  ;;  %v239_v32 = vpop.permute.xlu1 %238 }
  0xaf   : > { %v260_v33 = vmax.f32 %v220_v8, %v239_v32 }
  0xb0   : > { %v281_v34 = vrot.slane %v258_v31, 7 }
  0xb1   : > { %v283_v35 = vrot.slane %v260_v33, 7  ;;  %v237_v36 = vpop.permute.xlu0 %236  ;;  %v615_v33 = vld [vmem:[#allocation2 + $0x2] sm:$0xff] }
  0xb2   : > { %v298_v37 = vsel %vm297_vm3, 0.0, %v281_v34  ;;  %v306_v38 = vsel %vm297_vm3, %v281_v34, 0.0  ;;  %v259_v39 = vmax.f32 %v219_v11, %v237_v36  ;;  %v241_v40 = vpop.permute.xlu1 %240  ;;  %v1924_v11 = vld [vmem:[%s2874_s1 + $0x18] sm:$0xf] }
  0xb3   : > { %315 = vst.msk [vmem:[#allocation2 + $0x10] sm:$0xff] %vm266_vm0, %v298_v37  ;;  %v300_v41 = vsel %vm297_vm3, 0.0, %v283_v35  ;;  %v308_v42 = vsel %vm297_vm3, %v283_v35, 0.0  ;;  %v261_v43 = vmax.f32 %v221_v12, %v241_v40  ;;  %v1944_v35 = vld [vmem:[%s2874_s1 + $0x20] sm:$0xf]  ;;  %v1223_v37 = vld [vmem:[#allocation2 + $0x90] sm:$0xff] }
  0xb4   : > { %316 = vst.msk [vmem:[#allocation2 + $0x18] sm:$0x3] %vm268_vm1, %v306_v38  ;;  %320 = vst.msk [vmem:[#allocation2 + $0x38] sm:$0x3] %vm268_vm1, %v308_v42  ;;  %v282_v44 = vrot.slane %v259_v39, 7  ;;  %v1373_v39 = vld [vmem:[#allocation2 + $0x91] sm:$0xff] }
  0xb5   : > { %319 = vst.msk [vmem:[#allocation2 + $0x30] sm:$0xff] %vm266_vm0, %v300_v41  ;;  %v284_v45 = vrot.slane %v261_v43, 7  ;;  %v243_v46 = vpop.permute.xlu0 %242 }
  0xb6   : > { %v299_v47 = vsel %vm297_vm3, 0.0, %v282_v44  ;;  %v307_v48 = vsel %vm297_vm3, %v282_v44, 0.0  ;;  %v262_v49 = vmax.f32 %v222_v20, %v243_v46  ;;  %v245_v50 = vpop.permute.xlu1 %244 }
  0xb7   : > { %317 = vst.msk [vmem:[#allocation2 + $0x20] sm:$0xff] %vm266_vm0, %v299_v47  ;;  %v301_v51 = vsel %vm297_vm3, 0.0, %v284_v45  ;;  %v309_v52 = vsel %vm297_vm3, %v284_v45, 0.0  ;;  %v263_v53 = vmax.f32 %v223_v23, %v245_v50 }
  0xb8   : > { %318 = vst.msk [vmem:[#allocation2 + $0x28] sm:$0x3] %vm268_vm1, %v307_v48  ;;  %322 = vst.msk [vmem:[#allocation2 + $0x48] sm:$0x3] %vm268_vm1, %v309_v52  ;;  %v285_v54 = vrot.slane %v262_v49, 7 }
  0xb9   : > { %321 = vst.msk [vmem:[#allocation2 + $0x40] sm:$0xff] %vm266_vm0, %v301_v51  ;;  %v286_v55 = vrot.slane %v263_v53, 7  ;;  %v247_v56 = vpop.permute.xlu0 %246 }
  0xba   : > { %v302_v57 = vsel %vm297_vm3, 0.0, %v285_v54  ;;  %v310_v58 = vsel %vm297_vm3, %v285_v54, 0.0  ;;  %v264_v59 = vmax.f32 %v224_v28, %v247_v56  ;;  %v249_v61 = vpop.permute.xlu1 %248 }
  0xbb   : > { %v341_v60 = vld [vmem:[#allocation2 + $0x11] sm:$0xff]  ;;  %323 = vst.msk [vmem:[#allocation2 + $0x50] sm:$0xff] %vm266_vm0, %v302_v57  ;;  %v303_v63 = vsel %vm297_vm3, 0.0, %v286_v55  ;;  %v311_v0 = vsel %vm297_vm3, %v286_v55, 0.0  ;;  %v265_v1 = vmax.f32 %v225_v29, %v249_v61 }
  0xbc   : > { %324 = vst.msk [vmem:[#allocation2 + $0x58] sm:$0x3] %vm268_vm1, %v310_v58  ;;  %2044 = vmatmul.mubr.msk.f32.vlgmr.msra.gmra.mrb[0].mxu1 %vm266_vm0, %v341_v60  ;;  %2099 = vmatprep.mubr.msk.f32.mxu0 %vm266_vm0, %v341_v60  ;;  %326 = vst.msk [vmem:[#allocation2 + $0x68] sm:$0x3] %vm268_vm1, %v311_v0  ;;  %v287_v2 = vrot.slane %v264_v59, 7  ;;  %v2609_v3 = vld [vmem:[#allocation2 + $0x31] sm:$0xff] }
  0xbd   : > { %325 = vst.msk [vmem:[#allocation2 + $0x60] sm:$0xff] %vm266_vm0, %v303_v63  ;;  %2056 = vmatpush3.msk.msra.mxu1 %vm374_vm2, %v2554_v21  ;;  %v288_v4 = vrot.slane %v265_v1, 7  ;;  %v1065_v13 = vld [vmem:[#allocation2 + $0x12] sm:$0xff] }
  0xbe   : > { %2069 = vmatprep.subr.msk.mxu1 %vm374_vm2, %v1884_v62  ;;  %v304_v5 = vsel %vm297_vm3, 0.0, %v287_v2  ;;  %v312_v6 = vsel %vm297_vm3, %v287_v2, 0.0  ;;  %v2663_v20 = vld [vmem:[#allocation2 + $0x32] sm:$0xff]  ;;  %v333_v25 = vld [vmem:[#allocation2 + $0x20] sm:$0xff] }
  0xbf   : > { %v2614_v7 = vld [vmem:[#allocation2 + $0x21] sm:$0xff]  ;;  %327 = vst.msk [vmem:[#allocation2 + $0x70] sm:$0xff] %vm266_vm0, %v304_v5  ;;  %v305_v9 = vsel %vm297_vm3, 0.0, %v288_v4  ;;  %v313_v10 = vsel %vm297_vm3, %v288_v4, 0.0  ;;  %v334_v27 = vld [vmem:[#allocation2 + $0x30] sm:$0xff] }
  0xc0   : > { %328 = vst.msk [vmem:[#allocation2 + $0x78] sm:$0x3] %vm268_vm1, %v312_v6  ;;  %2046 = vmatprep.mubr.msk.f32.mxu1 %vm266_vm0, %v2614_v7  ;;  %2100 = vmatmul.mubr.msk.f32.vlgmr.msra.gmra.mrb[0].mxu0 %vm266_vm0, %v2614_v7  ;;  %v2622_v8 = vld [vmem:[#allocation2 + $0x41] sm:$0xff]  ;;  %330 = vst.msk [vmem:[#allocation2 + $0x88] sm:$0x3] %vm268_vm1, %v313_v10 }
  0xc1   : > { %2112 = vmatpush3.msk.msra.mxu0 %vm374_vm2, %v2559_v22  ;;  %2047 = vmatmul.mubr.msk.f32.gmra.mrb[2].mxu1 %vm266_vm0, %v2609_v3  ;;  %329 = vst.msk [vmem:[#allocation2 + $0x80] sm:$0xff] %vm266_vm0, %v305_v9  ;;  %v2651_v15 = vld [vmem:[#allocation2 + $0x22] sm:$0xff]  ;;  %v332_v22 = vld [vmem:[#allocation2 + $0x10] sm:$0xff] }
  0xc2   : > { %2102 = vmatprep.mubr.msk.f32.mxu0 %vm266_vm0, %v2609_v3  ;;  %2049 = vmatprep.mubr.msk.f32.mxu1 %vm266_vm0, %v2622_v8  ;;  %v2668_v21 = vld [vmem:[#allocation2 + $0x42] sm:$0xff]  ;;  %v336_v31 = vld [vmem:[#allocation2 + $0x50] sm:$0xff] }
  0xc3   : > { %v2639_v12 = vld [vmem:[#allocation2 + $0x51] sm:$0xff]  ;;  %2125 = vmatprep.subr.msk.mxu0 %vm374_vm2, %v1924_v11  ;;  %v335_v29 = vld [vmem:[#allocation2 + $0x40] sm:$0xff] }
  0xc4   : > { %2103 = vmatmul.mubr.msk.f32.gmra.mrb[2].mxu0 %vm266_vm0, %v2622_v8  ;;  %v2644_v14 = vld [vmem:[#allocation2 + $0x61] sm:$0xff]  ;;  %v2673_v23 = vld [vmem:[#allocation2 + $0x52] sm:$0xff] }
  0xc5   : > { %2050 = vmatmul.mubr.msk.f32.gmra.mrb[4].mxu1 %vm266_vm0, %v2639_v12  ;;  %2113 = vmatprep.mubr.msk.f32.mxu0 %vm266_vm0, %v1065_v13  ;;  %v2683_v26 = vld [vmem:[#allocation2 + $0x62] sm:$0xff] }
  0xc6   : > { %2052 = vmatprep.mubr.msk.f32.mxu1 %vm266_vm0, %v2644_v14  ;;  %v337_v32 = vld [vmem:[#allocation2 + $0x60] sm:$0xff]  ;;  %v338_v34 = vld [vmem:[#allocation2 + $0x70] sm:$0xff] }
  0xc7   : > { %v2653_v16 = vld [vmem:[#allocation2 + $0x71] sm:$0xff] }
  0xc8   : > { %2114 = vmatmul.mubr.msk.f32.vlgmr.msra.gmra.mrb[0].mxu0 %vm266_vm0, %v2651_v15  ;;  %v2688_v28 = vld [vmem:[#allocation2 + $0x72] sm:$0xff]  ;;  %v2693_v30 = vld [vmem:[#allocation2 + $0x82] sm:$0xff] }
  0xc9   : > { %2126 = vmatpush3.msk.msra.mxu0 %vm374_vm2, %v1924_v11  ;;  %2053 = vmatmul.mubr.msk.f32.gmra.mrb[6].mxu1 %vm266_vm0, %v2653_v16  ;;  %v1222_v36 = vld [vmem:[#allocation2 + $0x80] sm:$0xff] }
  0xca   : > { %2116 = vmatprep.mubr.msk.f32.mxu0 %vm266_vm0, %v2663_v20  ;;  %2057 = vmatprep.mubr.msk.f32.mxu1 %vm266_vm0, %v331_v17  ;;  %v1372_v38 = vld [vmem:[#allocation2 + $0x81] sm:$0xff] }
  0xcb   : > { %2139 = vmatprep.subr.msk.mxu0 %vm374_vm2, %v1934_v18 }
  0xcc   : > { %2117 = vmatmul.mubr.msk.f32.gmra.mrb[2].mxu0 %vm266_vm0, %v2668_v21 }
  0xcd   : > { %2058 = vmatmul.mubr.msk.f32.vlgmr.msra.gmra.mrb[0].mxu1 %vm266_vm0, %v332_v22  ;;  %2119 = vmatprep.mubr.msk.f32.mxu0 %vm266_vm0, %v2673_v23 }
  0xce   : > { %2060 = vmatprep.mubr.msk.f32.mxu1 %vm266_vm0, %v333_v25  ;;  %2070 = vmatpush3.msk.msra.mxu1 %vm374_vm2, %v1884_v62 }
  0xcf   : > { %2083 = vmatprep.subr.msk.mxu1 %vm374_vm2, %v1894_v24 }
  0xd0   : > { %2120 = vmatmul.mubr.msk.f32.gmra.mrb[4].mxu0 %vm266_vm0, %v2683_v26 }
  0xd1   : > { %2061 = vmatmul.mubr.msk.f32.gmra.mrb[2].mxu1 %vm266_vm0, %v334_v27  ;;  %2122 = vmatprep.mubr.msk.f32.mxu0 %vm266_vm0, %v2688_v28 }
  0xd2   : > { %2063 = vmatprep.mubr.msk.f32.mxu1 %vm266_vm0, %v335_v29 }
  0xd4   : > { %2123 = vmatmul.mubr.msk.f32.gmra.mrb[6].mxu0 %vm266_vm0, %v2693_v30 }
  0xd5   : > { %2064 = vmatmul.mubr.msk.f32.gmra.mrb[4].mxu1 %vm266_vm0, %v336_v31  ;;  %2127 = vmatprep.mubr.msk.f32.mxu0 %vm266_vm0, %v333_v25 }
  0xd6   : > { %2066 = vmatprep.mubr.msk.f32.mxu1 %vm266_vm0, %v337_v32 }
  0xd8   : > { %2128 = vmatmul.mubr.msk.f32.vlgmr.msra.gmra.mrb[0].mxu0 %vm266_vm0, %v334_v27 }
  0xd9   : > { %2140 = vmatpush3.msk.msra.mxu0 %vm374_vm2, %v1934_v18  ;;  %2067 = vmatmul.mubr.msk.f32.gmra.mrb[6].mxu1 %vm266_vm0, %v338_v34 }
  0xda   : > { %2130 = vmatprep.mubr.msk.f32.mxu0 %vm266_vm0, %v335_v29  ;;  %2071 = vmatprep.mubr.msk.f32.mxu1 %vm266_vm0, %v615_v33 }
  0xdb   : > { %2153 = vmatprep.subr.msk.mxu0 %vm374_vm2, %v1944_v35 }
  0xdc   : > { %2131 = vmatmul.mubr.msk.f32.gmra.mrb[2].mxu0 %vm266_vm0, %v336_v31 }
  0xdd   : > { %2072 = vmatmul.mubr.msk.f32.vlgmr.msra.gmra.mrb[0].mxu1 %vm266_vm0, %v1065_v13  ;;  %2133 = vmatprep.mubr.msk.f32.mxu0 %vm266_vm0, %v337_v32 }
  0xde   : > { %2074 = vmatprep.mubr.msk.f32.mxu1 %vm266_vm0, %v2651_v15  ;;  %2084 = vmatpush3.msk.msra.mxu1 %vm374_vm2, %v1894_v24 }
  0xdf   : > { %2167 = vmatprep.subr.msk.mxu1 %vm374_vm2, %v2547_v19 }
  0xe0   : > { %2134 = vmatmul.mubr.msk.f32.gmra.mrb[4].mxu0 %vm266_vm0, %v338_v34 }
  0xe1   : > { %2075 = vmatmul.mubr.msk.f32.gmra.mrb[2].mxu1 %vm266_vm0, %v2663_v20  ;;  %2136 = vmatprep.mubr.msk.f32.mxu0 %vm266_vm0, %v1222_v36 }
  0xe2   : > { %2077 = vmatprep.mubr.msk.f32.mxu1 %vm266_vm0, %v2668_v21 }
  0xe4   : > { %2137 = vmatmul.mubr.msk.f32.gmra.mrb[6].mxu0 %vm266_vm0, %v1223_v37 }
  0xe5   : > { %2078 = vmatmul.mubr.msk.f32.gmra.mrb[4].mxu1 %vm266_vm0, %v2673_v23  ;;  %2141 = vmatprep.mubr.msk.f32.mxu0 %vm266_vm0, %v2614_v7 }
  0xe6   : > { %2080 = vmatprep.mubr.msk.f32.mxu1 %vm266_vm0, %v2683_v26 }
  0xe8   : > { %2142 = vmatmul.mubr.msk.f32.vlgmr.msra.gmra.mrb[0].mxu0 %vm266_vm0, %v2609_v3 }
  0xe9   : > { %2154 = vmatpush3.msk.msra.mxu0 %vm374_vm2, %v1944_v35  ;;  %2081 = vmatmul.mubr.msk.f32.gmra.mrb[6].mxu1 %vm266_vm0, %v2688_v28 }
  0xea   : > { %2144 = vmatprep.mubr.msk.f32.mxu0 %vm266_vm0, %v2622_v8  ;;  %2085 = vmatprep.mubr.msk.f32.mxu1 %vm266_vm0, %v332_v22 }
  0xec   : > { %2145 = vmatmul.mubr.msk.f32.gmra.mrb[2].mxu0 %vm266_vm0, %v2639_v12 }
  0xed   : > { %2086 = vmatmul.mubr.msk.f32.vlgmr.msra.gmra.mrb[0].mxu1 %vm266_vm0, %v333_v25  ;;  %2147 = vmatprep.mubr.msk.f32.mxu0 %vm266_vm0, %v2644_v14 }
  0xee   : > { %2088 = vmatprep.mubr.msk.f32.mxu1 %vm266_vm0, %v334_v27  ;;  %2168 = vmatpush3.msk.msra.mxu1 %vm374_vm2, %v2547_v19  ;;  %v1523_v19 = vld [vmem:[#allocation2 + $0x92] sm:$0xff] }
  0xf0   : > { %2148 = vmatmul.mubr.msk.f32.gmra.mrb[4].mxu0 %vm266_vm0, %v2653_v16 }
  0xf1   : > { %2089 = vmatmul.mubr.msk.f32.gmra.mrb[2].mxu1 %vm266_vm0, %v335_v29  ;;  %2150 = vmatprep.mubr.msk.f32.mxu0 %vm266_vm0, %v1372_v38 }
  0xf2   : > { %2091 = vmatprep.mubr.msk.f32.mxu1 %vm266_vm0, %v336_v31 }
  0xf4   : > { %2151 = vmatmul.mubr.msk.f32.gmra.mrb[6].mxu0 %vm266_vm0, %v1373_v39 }
  0xf5   : > { %2092 = vmatmul.mubr.msk.f32.gmra.mrb[4].mxu1 %vm266_vm0, %v337_v32  ;;  %2155 = vmatprep.mubr.msk.f32.mxu0 %vm266_vm0, %v2651_v15 }
  0xf6   : > { %2094 = vmatprep.mubr.msk.f32.mxu1 %vm266_vm0, %v338_v34 }
  0xf8   : > { %2156 = vmatmul.mubr.msk.f32.vlgmr.msra.gmra.mrb[0].mxu0 %vm266_vm0, %v2663_v20 }
  0xf9   : > { %2095 = vmatmul.mubr.msk.f32.gmra.mrb[6].mxu1 %vm266_vm0, %v1222_v36  ;;  %2158 = vmatprep.mubr.msk.f32.mxu0 %vm266_vm0, %v2668_v21 }
  0xfa   : > { %2105 = vmatprep.mubr.msk.f32.mxu1 %vm266_vm0, %v2639_v12 }
  0xfc   : > { %2159 = vmatmul.mubr.msk.f32.gmra.mrb[2].mxu0 %vm266_vm0, %v2673_v23 }
  0xfd   : > { %2106 = vmatmul.mubr.msk.f32.vlgmr.msra.gmra.mrb[4].mxu1 %vm266_vm0, %v2644_v14  ;;  %2161 = vmatprep.mubr.msk.f32.mxu0 %vm266_vm0, %v2683_v26 }
  0xfe   : > { %2108 = vmatprep.mubr.msk.f32.mxu1 %vm266_vm0, %v2653_v16 }
 0x100   : > { %2162 = vmatmul.mubr.msk.f32.gmra.mrb[4].mxu0 %vm266_vm0, %v2688_v28 }
 0x101   : > { %2109 = vmatmul.mubr.msk.f32.gmra.mrb[6].mxu1 %vm266_vm0, %v1372_v38  ;;  %2164 = vmatprep.mubr.msk.f32.mxu0 %vm266_vm0, %v2693_v30 }
 0x104   : > { %2165 = vmatmul.mubr.msk.f32.gmra.mrb[6].mxu0 %vm266_vm0, %v1523_v19 }
 0x1c0   : > { %v2087_v40 = vpop.f32.mrb[0].mxu1 }
 0x1c1   : > { %v868_v41 = vpop.f32.mrb[1].mxu1 }
 0x1c4   : > { %v2090_v42 = vpop.f32.mrb[2].mxu1 }
 0x1c5   : > { %v878_v43 = vpop.f32.mrb[3].mxu1 }
 0x1cb   : > { %v2157_v44 = vpop.f32.mrb[0].mxu0 }
 0x1cc   : > { %v2169_v45 = vadd.f32 %v2157_v44, %v2087_v40  ;;  %v1619_v46 = vpop.f32.mrb[1].mxu0 }
 0x1cd   : > { %v2170_v47 = vadd.f32 %v1619_v46, %v868_v41 }
 0x1ce   : > { %v1668_v48 = vsel %vm1666_vm4, %v2169_v45, 0.0  ;;  %1730 = vst.msk [vmem:[%s2783_s19 + $0x8] sm:$0xff] %vm1666_vm4, %v2169_v45 }
 0x1cf   : > { %v1667_v49 = vsel %vm1666_vm4, %v2170_v47, 0.0  ;;  %1729 = vst.msk [vmem:[%s2783_s19] sm:$0xff] %vm1666_vm4, %v2170_v47  ;;  %v2160_v50 = vpop.f32.mrb[2].mxu0 }
 0x1d0   : > { %v1669_v51 = vadd.f32 %v1668_v48, %v1667_v49  ;;  %v2171_v52 = vadd.f32 %v2160_v50, %v2090_v42  ;;  %v2107_v53 = vpop.f32.mrb[4].mxu1  ;;  %v1629_v54 = vpop.f32.mrb[3].mxu0 }
 0x1d1   : > { %v2172_v55 = vadd.f32 %v1629_v54, %v878_v43  ;;  %v1038_v56 = vpop.f32.mrb[5].mxu1 }
 0x1d2   : > { %1732 = vst.msk [vmem:[%s2783_s19 + $0x18] sm:$0xff] %vm1666_vm4, %v2171_v52  ;;  %v1672_v63 = vsel %vm1666_vm4, %v2171_v52, 0.0 }
 0x1d3   : > { %v1670_v57 = vsel %vm1666_vm4, %v2172_v55, 0.0  ;;  %1731 = vst.msk [vmem:[%s2783_s19 + $0x10] sm:$0xff] %vm1666_vm4, %v2172_v55  ;;  %v2163_v58 = vpop.f32.mrb[4].mxu0 }
 0x1d4   : > { %v1671_v59 = vadd.f32 %v1670_v57, %v1669_v51  ;;  %v2173_v60 = vadd.f32 %v2163_v58, %v2107_v53  ;;  %v2110_v61 = vpop.f32.mrb[6].mxu1  ;;  %v1639_v62 = vpop.f32.mrb[5].mxu0 }
 0x1d5   : > { %v2174_v0 = vadd.f32 %v1639_v62, %v1038_v56  ;;  %v1048_v1 = vpop.f32.mrb[7].mxu1 }
 0x1d6   : > { %1734 = vst.msk [vmem:[%s2783_s19 + $0x28] sm:$0xff] %vm1666_vm4, %v2173_v60  ;;  %v1673_v2 = vadd.f32 %v1672_v63, %v1671_v59  ;;  %v1676_v8 = vsel %vm1666_vm4, %v2173_v60, 0.0 }
 0x1d7   : > { %v1674_v3 = vsel %vm1666_vm4, %v2174_v0, 0.0  ;;  %1733 = vst.msk [vmem:[%s2783_s19 + $0x20] sm:$0xff] %vm1666_vm4, %v2174_v0  ;;  %v2166_v4 = vpop.f32.mrb[6].mxu0 }
 0x1d8   : > { %v1675_v5 = vadd.f32 %v1674_v3, %v1673_v2  ;;  %v2175_v6 = vadd.f32 %v2166_v4, %v2110_v61  ;;  %v1649_v7 = vpop.f32.mrb[7].mxu0 }
 0x1d9   : > { %v2176_v9 = vadd.f32 %v1649_v7, %v1048_v1 }
 0x1da   : > { %1736 = vst.msk [vmem:[%s2783_s19 + $0x38] sm:$0xff] %vm1666_vm4, %v2175_v6  ;;  %v1677_v10 = vadd.f32 %v1676_v8, %v1675_v5  ;;  %v1680_v13 = vsel %vm1666_vm4, %v2175_v6, 0.0 }
 0x1db   : > { %v1678_v11 = vsel %vm1666_vm4, %v2176_v9, 0.0  ;;  %1735 = vst.msk [vmem:[%s2783_s19 + $0x30] sm:$0xff] %vm1666_vm4, %v2176_v9 }
 0x1dc   : > { %v1679_v12 = vadd.f32 %v1678_v11, %v1677_v10 }
 0x1de   : > { %v1681_v14 = vadd.f32 %v1680_v13, %v1679_v12 }
 0x1e0   : > { %v1682_v15 = vrot.slane %v1681_v14, 4 }
 0x1e2   : > { %v1683_v16 = vadd.f32 %v1682_v15, %v1681_v14 }
 0x1e4   : > { %v1684_v17 = vrot.slane %v1683_v16, 2 }
 0x1e6   : > { %v1685_v18 = vadd.f32 %v1684_v17, %v1683_v16 }
 0x1e8   : > { %v1686_v20 = vrot.slane %v1685_v18, 1 }
 0x1ea   : > { %v1687_v21 = vadd.f32 %v1686_v20, %v1685_v18 }
 0x1ec   : > { %v1688_v22 = vmul.f32 0.015625, %v1687_v21 }
 0x1ee   : > { %v1689_v23 = vsub.f32 %v2170_v47, %v1688_v22  ;;  %v1690_v24 = vsub.f32 %v2169_v45, %v1688_v22  ;;  %v1691_v25 = vsub.f32 %v2172_v55, %v1688_v22  ;;  %v1692_v26 = vsub.f32 %v2171_v52, %v1688_v22  ;;  %1698 = vst.msk [vmem:[%s2810_s22] sm:$0x1] %vm1697_vm5, %v1688_v22 }
 0x1ef   : > { %v1693_v27 = vsub.f32 %v2174_v0, %v1688_v22  ;;  %v1694_v28 = vsub.f32 %v2173_v60, %v1688_v22  ;;  %v1695_v29 = vsub.f32 %v2176_v9, %v1688_v22  ;;  %v1696_v30 = vsub.f32 %v2175_v6, %v1688_v22 }
 0x1f0   : > { %v1699_v31 = vmul.f32 %v1689_v23, %v1689_v23  ;;  %v1700_v32 = vmul.f32 %v1690_v24, %v1690_v24  ;;  %v1701_v33 = vmul.f32 %v1691_v25, %v1691_v25  ;;  %v1702_v34 = vmul.f32 %v1692_v26, %v1692_v26 }
 0x1f1   : > { %v1703_v38 = vmul.f32 %v1693_v27, %v1693_v27  ;;  %v1704_v40 = vmul.f32 %v1694_v28, %v1694_v28  ;;  %v1705_v43 = vmul.f32 %v1695_v29, %v1695_v29  ;;  %v1706_v46 = vmul.f32 %v1696_v30, %v1696_v30 }
 0x1f2   : > { %v1707_v35 = vsel %vm1666_vm4, %v1699_v31, 0.0  ;;  %v1708_v36 = vsel %vm1666_vm4, %v1700_v32, 0.0  ;;  %v1710_v39 = vsel %vm1666_vm4, %v1701_v33, 0.0  ;;  %v1712_v41 = vsel %vm1666_vm4, %v1702_v34, 0.0 }
 0x1f3   : > { %v1709_v37 = vadd.f32 %v1708_v36, %v1707_v35  ;;  %v1714_v44 = vsel %vm1666_vm4, %v1703_v38, 0.0  ;;  %v1716_v47 = vsel %vm1666_vm4, %v1704_v40, 0.0  ;;  %v1718_v49 = vsel %vm1666_vm4, %v1705_v43, 0.0 }
 0x1f4   : > { %v1720_v51 = vsel %vm1666_vm4, %v1706_v46, 0.0 }
 0x1f5   : > { %v1711_v19 = vadd.f32 %v1710_v39, %v1709_v37 }
 0x1f7   : > { %v1713_v42 = vadd.f32 %v1712_v41, %v1711_v19 }
 0x1f9   : > { %v1715_v45 = vadd.f32 %v1714_v44, %v1713_v42 }
 0x1fb   : > { %v1717_v48 = vadd.f32 %v1716_v47, %v1715_v45 }
 0x1fd   : > { %v1719_v50 = vadd.f32 %v1718_v49, %v1717_v48 }
 0x1ff   : > { %v1721_v52 = vadd.f32 %v1720_v51, %v1719_v50 }
 0x201   : > { %v1722_v53 = vrot.slane %v1721_v52, 4 }
 0x203   : > { %v1723_v54 = vadd.f32 %v1722_v53, %v1721_v52 }
 0x205   : > { %v1724_v55 = vrot.slane %v1723_v54, 2 }
 0x207   : > { %v1725_v56 = vadd.f32 %v1724_v55, %v1723_v54 }
 0x209   : > { %v1726_v57 = vrot.slane %v1725_v56, 1 }
 0x20b   : > { %v1727_v58 = vadd.f32 %v1726_v57, %v1725_v56 }
 0x20d   : > { %1728 = vst.msk [vmem:[%s2810_s22 + $0x1] sm:$0x1] %vm1697_vm5, %v1727_v58 }
 0x20e   : > { %2326 = shalt.err (!%p2323_p4)
}
 0x20f   : > { %s2327_s5 = scalar_lea.hbm %s2827_s30, 32  ;;  %s2331_s7 = scalar_lea.hbm %s2876_s3, 64 }
 0x210   : > { %p2328_p5 = scmp.ne.s32.totalorder %s2827_s30, %s2327_s5  ;;  %p2332_p1 = scmp.lt.u32.totalorder %s2827_s30, %s2876_s3 }
 0x211   : > { %p2333_p3 = scmp.lt.u32.totalorder %s2331_s7, %s2327_s5  ;;  %p2335_p11 = scmp.lt.u32.totalorder %s2327_s5, %s2827_s30 }
 0x212   : > { %p2329_p7 = pnand %p2328_p5, %p2883_p12 }
 0x213   : > { %p2334_p6 = por %p2333_p3, %p2332_p1 }
 0x214   : > { %p2330_p9 = pneg %p2329_p7 }
 0x215   : > { %p2336_p13 = por %p2335_p11, %p2334_p6 }
 0x217   : > { %p2337_p8 = pnand %p2336_p13, %p2330_p9 }
 0x219   : > { %2340 = shalt.err (!%p2337_p8)
}
 0x21a   : > { %2235 = dma.vmem_to_hbm [thread:$0]  (%p2883_p12), %s2829_s27, 32, %s2827_s30, %s1743_s9  }
 0x21b PF: > { %s1779_s19 = sand.u32 1, %s2367_s12   ;;  %p2884_p10 = scmp.ne.s32.totalorder %s2881_s25, 0 }
 0x21c   : > { %p2885_p0 = scmp.ge.s32.totalorder %s2379_s15, 2  ;;  %s1780_s20 = scalar_lea.sflag [#allocation5], %s1779_s19 }
 0x21e   : > { %p2242_p2 = pnand %p2885_p0, %p2884_p10 }
 0x220   : > { %2362 = dma.done.wait (!%p2242_p2), %s1780_s20, 32  }
 0x221   : > { %2364 = vsyncadd (!%p2242_p2), %s1780_s20, 4294967264  ;;  %p17_p4 = scmp.ge.s32.totalorder %s2432_s18, 4   ;;  %s2886_s12 = smov %s2371_s13 }
 0x222   : > { %s2887_s13 = smov %s2375_s14  ;;  %s2888_s14 = smov %s2444_s21 }
 0x223   : > { %s2889_s15 = smov %s2432_s18  ;;  %19 = sbr.rel (!%p17_p4) target bundleno = 5 (0x5), region = 96 }
 0x22a   :  { %1785 = vsyncpa [#allocation4], 1 }
 0x22b   :  { %1787 = vsyncpa [#allocation4 + $0x1], 1 }
 0x22c   :  { %1788 = vsyncpa [#allocation5], 1 }
 0x22d   :  { %1790 = vsyncpa [#allocation5 + $0x1], 1 }

</bundles_post_ra>
